<compile_context>
chip_gen: v5e
topology: v5e:2x2
jax: 0.10.0
libtpu: 0.0.40
codegen_flags: <defaults>
</compile_context>

<pallas_src>
import functools

import jax
import jax.numpy as jnp
from jax.experimental import pallas as pl
from jax.experimental.pallas import tpu as pltpu


# ------------------------- fused single-pass kernel -------------------------

def _fused_kernel(x_ref, w1t_ref, w2_ref, o_ref, *, inv_hw):
    """x_ref/o_ref: (1, C, HW) native dtype.
    w1t_ref: (C, mid) == fc1.weight.T.   w2_ref: (C, mid) == fc2.weight."""
    x = x_ref[0]                                                        # (C, HW)

    # Squeeze: per-channel mean over spatial positions (f32 accumulate, lane reduce).
    pooled = jnp.sum(x.astype(jnp.float32), axis=-1, keepdims=True) * inv_hw   # (C, 1)

    # Excite.  fc1 + ReLU:  h[m] = sum_c w1[m, c] * pooled[c]   (sublane reduce over C)
    h = jnp.sum(w1t_ref[...] * pooled, axis=0, keepdims=True)          # (1, mid) f32
    h = jnp.maximum(h, 0.0)
    # fc2:  z[c] = sum_m w2[c, m] * h[m]                        (lane reduce over mid)
    z = jnp.sum(w2_ref[...] * h, axis=-1, keepdims=True)               # (C, 1) f32
    s = pl.reciprocal(1.0 + jnp.exp(-z))                               # sigmoid (exact)

    # Scale: multiply in f32, single downcast to the output dtype.
    o_ref[0] = (x * s).astype(o_ref.dtype)


def _se_block_fused(x_flat, w1, w2, hw):
    B, C, HW = x_flat.shape
    mid = w1.shape[0]
    w1t = w1.T                              # (C, mid); tiny one-time transpose, fused by XLA
    return pl.pallas_call(
        functools.partial(_fused_kernel, inv_hw=1.0 / hw),
        out_shape=jax.ShapeDtypeStruct(x_flat.shape, x_flat.dtype),
        grid=(B,),
        in_specs=[
            pl.BlockSpec((1, C, HW), lambda b: (b, 0, 0)),   # per-image slab
            pl.BlockSpec((C, mid), lambda b: (0, 0)),        # resident weights
            pl.BlockSpec((C, mid), lambda b: (0, 0)),
        ],
        out_specs=pl.BlockSpec((1, C, HW), lambda b: (b, 0, 0)),
        compiler_params=pltpu.CompilerParams(
            dimension_semantics=("parallel",),
            vmem_limit_bytes=48 << 20),
    )(x_flat, w1t, w2)


# ----------------------- tiled fallback (huge C*HW slabs) --------------------

def _pool_kernel(x_ref, pooled_ref, *, inv_hw):
    """x_ref: (1, t_c, HW) native dtype.  pooled_ref: (1, t_c, 1) f32."""
    pooled_ref[...] = jnp.sum(x_ref[...].astype(jnp.float32), axis=-1,
                              keepdims=True) * inv_hw


def _scale_kernel(x_ref, s_ref, o_ref):
    """x_ref/o_ref: (1, t_c, HW) native dtype.  s_ref: (1, t_c, 1) f32.
    Multiply in f32 (promotion), single downcast."""
    o_ref[...] = (x_ref[...] * s_ref[...]).astype(o_ref.dtype)


def _pick_c_tile(C, HW, itemsize):
    """Channel tile: a multiple of 8 (or the full C), sized so one (t_c, HW)
    native-dtype block stays around <= 2 MiB (double-buffered in+out ~8 MiB)."""
    budget = 2 << 20
    rows_fit = max(1, budget // max(1, HW * itemsize))
    if C <= 8 or rows_fit >= C:
        return C
    return int(max(8, min(256, (rows_fit // 8) * 8)))


def _se_block_tiled(x_flat, w1, w2, hw):
    B, C, HW = x_flat.shape
    t_c = _pick_c_tile(C, HW, x_flat.dtype.itemsize)
    n_c = pl.cdiv(C, t_c)
    params = pltpu.CompilerParams(
        dimension_semantics=("parallel", "parallel"),
        vmem_limit_bytes=48 << 20)

    # Pass 1: per-channel mean over the full (un-padded) spatial extent.
    pooled = pl.pallas_call(
        functools.partial(_pool_kernel, inv_hw=1.0 / hw),
        out_shape=jax.ShapeDtypeStruct((B, C, 1), jnp.float32),
        grid=(B, n_c),
        in_specs=[pl.BlockSpec((1, t_c, HW), lambda b, c: (b, c, 0))],
        out_specs=pl.BlockSpec((1, t_c, 1), lambda b, c: (b, c, 0)),
        compiler_params=params,
    )(x_flat)

    # Excitation FC in plain jnp: ~B*C*mid FLOPs — a separate Pallas launch would
    # only add fixed overhead and HBM round trips.  dot_general avoids explicit
    # weight transposes.
    p2d = pooled[:, :, 0]                                              # (B, C) f32
    h = jax.lax.dot_general(p2d, w1, (((1,), (1,)), ((), ())),
                            preferred_element_type=jnp.float32)        # (B, mid)
    h = jnp.maximum(h, 0.0)
    z = jax.lax.dot_general(h, w2, (((1,), (1,)), ((), ())),
                            preferred_element_type=jnp.float32)        # (B, C)
    s = jax.nn.sigmoid(z)[:, :, None]                                  # (B, C, 1) f32

    # Pass 2: broadcast scale, same tiling, fully parallel.
    out_flat = pl.pallas_call(
        _scale_kernel,
        out_shape=jax.ShapeDtypeStruct(x_flat.shape, x_flat.dtype),
        grid=(B, n_c),
        in_specs=[pl.BlockSpec((1, t_c, HW), lambda b, c: (b, c, 0)),
                  pl.BlockSpec((1, t_c, 1), lambda b, c: (b, c, 0))],
        out_specs=pl.BlockSpec((1, t_c, HW), lambda b, c: (b, c, 0)),
        compiler_params=params,
    )(x_flat, s)
    return out_flat


# --------------------------------- wrapper ----------------------------------

@jax.jit
def se_block(x, w1, w2):
    """x: (B, C, H, W).  w1: (mid, C) = fc1.weight, w2: (C, mid) = fc2.weight (no bias)."""
    B, C, H, W = x.shape
    HW = H * W
    x_flat = x.reshape(B, C, HW)           # contiguous -> free reshape, no copy

    # Fused path whenever the per-image slab comfortably fits the VMEM budget
    # (true for essentially all real SE shapes); tiled fallback otherwise.
    if C * HW * 4 <= (4 << 20):
        out_flat = _se_block_fused(x_flat, w1, w2, HW)
    else:
        out_flat = _se_block_tiled(x_flat, w1, w2, HW)

    return out_flat.reshape(B, C, H, W)    # free reshape (no trailing slice)


def se_block_ref(x, w1, w2):
    """Pure-JAX reference matching the PyTorch module."""
    pooled = jnp.mean(x, axis=(2, 3))                      # (B, C)
    h = jnp.maximum(pooled @ w1.T, 0.0)                    # (B, mid)
    s = jax.nn.sigmoid(h @ w2.T)                           # (B, C)
    return x * s[:, :, None, None]


if __name__ == "__main__":
    # Small shapes consistent with the module: batch=2, channels=4, spatial=16, rate=2.
    B, C, H, W = 2, 4, 16, 16
    rate = 2
    mid = C // rate

    key = jax.random.PRNGKey(0)
    kx, k1, k2 = jax.random.split(key, 3)
    x = jax.random.normal(kx, (B, C, H, W), dtype=jnp.float32)
    w1 = jax.random.normal(k1, (mid, C), dtype=jnp.float32) * 0.5   # fc1.weight (mid, C)
    w2 = jax.random.normal(k2, (C, mid), dtype=jnp.float32) * 0.5   # fc2.weight (C, mid)

    ref = se_block_ref(x, w1, w2)

    # Main (fused) path.
    out = jax.block_until_ready(se_block(x, w1, w2))
    assert out.shape == (B, C, H, W)
    assert jnp.allclose(out, ref, atol=1e-5, rtol=1e-5), "fused path mismatch vs reference"

    # Also exercise the tiled fallback path once at the same small shape.
    tiled = jax.jit(
        lambda a, b, c: _se_block_tiled(a.reshape(B, C, H * W), b, c, H * W)
        .reshape(B, C, H, W))
    out2 = jax.block_until_ready(tiled(x, w1, w2))
    assert jnp.allclose(out2, ref, atol=1e-5, rtol=1e-5), "tiled path mismatch vs reference"

    print("KERNEL_OK")
</pallas_src>

<mosaic_0001>
module attributes {stable_mosaic.version = 11 : i64} {
  func.func @_fused_kernel(%arg0: i32, %arg1: memref<1x4x256xf32, #tpu.memory_space<vmem>>, %arg2: memref<4x2xf32, #tpu.memory_space<vmem>>, %arg3: memref<4x2xf32, #tpu.memory_space<vmem>>, %arg4: memref<1x4x256xf32, #tpu.memory_space<vmem>>) attributes {dimension_semantics = [#tpu.dimension_semantics<parallel>], iteration_bounds = array<i64: 2>, scalar_prefetch = 0 : i64, scratch_operands = 0 : i64, tpu.core_type = #tpu.core_type<tc>, window_params = [{transform_indices = @transform_0, window_bounds = array<i64: 1, 4, 256>}, {pipeline_mode = #tpu.pipeline_mode<synchronous>, transform_indices = @transform_1, window_bounds = array<i64: 4, 2>}, {pipeline_mode = #tpu.pipeline_mode<synchronous>, transform_indices = @transform_2, window_bounds = array<i64: 4, 2>}, {transform_indices = @transform_3, window_bounds = array<i64: 1, 4, 256>}]} {
    %c0 = arith.constant 0 : index
    %c0_0 = arith.constant 0 : index
    %c0_1 = arith.constant 0 : index
    %0 = vector.load %arg1[%c0, %c0_0, %c0_1] : memref<1x4x256xf32, #tpu.memory_space<vmem>>, vector<1x4x256xf32>
    %1 = vector.shape_cast %0 : vector<1x4x256xf32> to vector<4x256xf32>
    %cst = arith.constant dense<0.000000e+00> : vector<4xf32>
    %2 = vector.multi_reduction <add>, %1, %cst [1] : vector<4x256xf32> to vector<4xf32>
    %3 = vector.shape_cast %2 : vector<4xf32> to vector<4x1xf32>
    %cst_2 = arith.constant 3.906250e-03 : f32
    %4 = vector.broadcast %cst_2 : f32 to vector<4x1xf32>
    %5 = arith.mulf %3, %4 : vector<4x1xf32>
    %c0_3 = arith.constant 0 : index
    %c0_4 = arith.constant 0 : index
    %6 = vector.load %arg2[%c0_3, %c0_4] : memref<4x2xf32, #tpu.memory_space<vmem>>, vector<4x2xf32>
    %7 = vector.broadcast %5 : vector<4x1xf32> to vector<4x2xf32>
    %8 = arith.mulf %6, %7 : vector<4x2xf32>
    %cst_5 = arith.constant dense<0.000000e+00> : vector<2xf32>
    %9 = vector.multi_reduction <add>, %8, %cst_5 [0] : vector<4x2xf32> to vector<2xf32>
    %10 = vector.shape_cast %9 : vector<2xf32> to vector<1x2xf32>
    %cst_6 = arith.constant 0.000000e+00 : f32
    %11 = vector.broadcast %cst_6 : f32 to vector<1x2xf32>
    %12 = arith.maximumf %10, %11 : vector<1x2xf32>
    %c0_7 = arith.constant 0 : index
    %c0_8 = arith.constant 0 : index
    %13 = vector.load %arg3[%c0_7, %c0_8] : memref<4x2xf32, #tpu.memory_space<vmem>>, vector<4x2xf32>
    %14 = vector.broadcast %12 : vector<1x2xf32> to vector<4x2xf32>
    %15 = arith.mulf %13, %14 : vector<4x2xf32>
    %cst_9 = arith.constant dense<0.000000e+00> : vector<4xf32>
    %16 = vector.multi_reduction <add>, %15, %cst_9 [1] : vector<4x2xf32> to vector<4xf32>
    %17 = vector.shape_cast %16 : vector<4xf32> to vector<4x1xf32>
    %cst_10 = arith.constant 0.000000e+00 : f32
    %18 = vector.broadcast %cst_10 : f32 to vector<4x1xf32>
    %19 = arith.subf %18, %17 : vector<4x1xf32>
    %20 = math.exp %19 : vector<4x1xf32>
    %cst_11 = arith.constant 1.000000e+00 : f32
    %21 = vector.broadcast %cst_11 : f32 to vector<4x1xf32>
    %22 = arith.addf %21, %20 : vector<4x1xf32>
    %23 = tpu.reciprocal %22 : vector<4x1xf32> -> vector<4x1xf32>
    %24 = vector.broadcast %23 : vector<4x1xf32> to vector<4x256xf32>
    %25 = arith.mulf %1, %24 : vector<4x256xf32>
    %c0_12 = arith.constant 0 : index
    %c0_13 = arith.constant 0 : index
    %c0_14 = arith.constant 0 : index
    %26 = vector.load %arg4[%c0_12, %c0_13, %c0_14] : memref<1x4x256xf32, #tpu.memory_space<vmem>>, vector<1x4x256xf32>
    %27 = vector.shape_cast %26 : vector<1x4x256xf32> to vector<4x256xf32>
    %28 = vector.shape_cast %25 : vector<4x256xf32> to vector<1x4x256xf32>
    tpu.vector_store %arg4[%c0_12, %c0_13, %c0_14], %28 {strides = array<i32>} : memref<1x4x256xf32, #tpu.memory_space<vmem>>, vector<1x4x256xf32>,
    return
  }
  func.func @transform_0(%arg0: i32) -> (i32, i32, i32) {
    %c0_i32 = arith.constant 0 : i32
    %c0_i32_0 = arith.constant 0 : i32
    %c0_i32_1 = arith.constant 0 : i32
    return %arg0, %c0_i32, %c0_i32_0 : i32, i32, i32
  }
  func.func @transform_1(%arg0: i32) -> (i32, i32) {
    %c0_i32 = arith.constant 0 : i32
    %c0_i32_0 = arith.constant 0 : i32
    %c0_i32_1 = arith.constant 0 : i32
    return %c0_i32, %c0_i32_0 : i32, i32
  }
  func.func @transform_2(%arg0: i32) -> (i32, i32) {
    %c0_i32 = arith.constant 0 : i32
    %c0_i32_0 = arith.constant 0 : i32
    %c0_i32_1 = arith.constant 0 : i32
    return %c0_i32, %c0_i32_0 : i32, i32
  }
  func.func @transform_3(%arg0: i32) -> (i32, i32, i32) {
    %c0_i32 = arith.constant 0 : i32
    %c0_i32_0 = arith.constant 0 : i32
    %c0_i32_1 = arith.constant 0 : i32
    return %arg0, %c0_i32, %c0_i32_0 : i32, i32, i32
  }
}

</mosaic_0001>

<bundles_post_ra>
// kernel: se_block.1
= control target key start
LH: loop header
LB: loop body
LE: loop exit
PB: predicated region body
PF: predicated region fallthrough
CT: control target
= control target key end

     0   :  { %s337_s12 = smov 0   ;;  %s367_s0 = inlined_call_operand.vmem [shape: f32[2,4,256], index: 0, kind: input, shape index: {}]   ;;  %s368_s1 = inlined_call_operand.vmem [shape: f32[4,2], index: 1, kind: input, shape index: {}]   ;;  %s369_s2 = inlined_call_operand.vmem [shape: f32[4,2], index: 2, kind: input, shape index: {}]   ;;  %s370_s3 = inlined_call_operand.vmem [shape: f32[2,4,256], index: 3, kind: output, shape index: {}]  }
   0x1 LB: > { %s282_s13 = sadd.s32 4294967295, %s314_s12   ;;  %p286_p0 = scmp.ge.s32.totalorder %s314_s12, 1  ;;  %s314_s12 = sphi %s337_s12, %s13_s12  }
   0x2   : > { %p137_p1 = scmp.lt.s32.totalorder %s314_s12, 3 }
   0x4   : > { %p138_p2 = pnand %p286_p0, %p137_p1 }
   0x5   : > { %p161_p3 = scmp.lt.s32.totalorder (!%p138_p2), %s282_s13, 1 }
   0x6   : > { %141 = sbr.rel (%p138_p2) target bundleno = 315 (0x13b), region = 32 }
   0xb   : > { %s372_s13 = smov (!%p161_p3, %s282_s13), 1  ;;  %vm178_vm0 = vcmask 1043456   ;;  %v185_v6 = vld [vmem:[%s368_s1] sm:$0xf]  ;;  %vm187_vm1 = vcmask 11264  }
   0xc   : > { %s293_s14 = sshll.u32 %s372_s13, 3  ;;  %v196_v17 = vld [vmem:[%s369_s2] sm:$0xf]  ;;  %v316_v28 = vmov 839922192  }
   0xd   : > { %s165_s17 = scalar_lea.vmem %s367_s0, %s293_s14  ;;  %v221_v29 = vunpack.c.l.s4 %v316_v28  ;;  %s170_s24 = scalar_lea.vmem %s370_s3, %s293_s14 }
   0xe   : > { %v171_v0 = vld [vmem:[%s165_s17] sm:$0xff] }
   0xf   : > { %173 = vst [vmem:[#allocation1] ss:$2 sm:$0xff] %v171_v0  ;;  %v222_v34 = vunpack.c.0.s8 %v221_v29 }
  0x16   : > { %v174_v1 = vld.sshfl [vmem:[#allocation1] sm:$0xff pattern:$0x75316420]  ;;  %v175_v2 = vld.sshfl [vmem:[#allocation1 + $0x8] sm:$0xff pattern:$0x75316420] }
  0x17   : > { %v179_v3 = vsel %vm178_vm0, %v174_v1, 0.0  ;;  %v180_v4 = vsel %vm178_vm0, %v175_v2, 0.0 }
  0x18   : > { %v181_v5 = vadd.f32 %v180_v4, %v179_v3 }
  0x1a   : > { %182 = vadd.xlane.f32.xlu0 %v181_v5 }
  0x8d   : > { %v183_v7 = vpop.xlane.xlu0 %182 }
  0x8e   : > { %v184_v8 = vmul.f32 0.00390625, %v183_v7 }
  0x90   : > { %v186_v9 = vmul.f32 %v185_v6, %v184_v8 }
  0x92   : > { %v188_v10 = vsel %vm187_vm1, %v186_v9, 0.0 }
  0x93   : > { %v189_v11 = vrot.slane %v188_v10, 4 }
  0x95   : > { %v190_v12 = vadd.f32 %v189_v11, %v188_v10 }
  0x97   : > { %v191_v13 = vrot.slane %v190_v12, 2 }
  0x99   : > { %v192_v14 = vadd.f32 %v191_v13, %v190_v12 }
  0x9b   : > { %v193_v15 = vrot.slane %v192_v14, 1 }
  0x9d   : > { %v194_v16 = vadd.f32 %v193_v15, %v192_v14 }
  0x9f   : > { %v195_v18 = vmax.f32 %v194_v16, 0.0 }
  0xa1   : > { %v197_v19 = vmul.f32 %v196_v17, %v195_v18 }
  0xa3   : > { %v198_v20 = vsel %vm187_vm1, %v197_v19, 0.0 }
  0xa4   : > { %199 = vadd.xlane.f32.xlu0 %v198_v20 }
 0x117   : > { %v200_v21 = vpop.xlane.xlu0 %199 }
 0x118   : > { %v201_v22 = vsub.f32 0.0, %v200_v21 }
 0x11a   : > { %v202_v23 = vmul.f32 1.442695, %v201_v22 }
 0x11c   : > { %304 = vpow2.f32 %v202_v23 }
 0x122   : > { %v305_v24 = vpop.eup %304 }
 0x123   : > { %v204_v25 = vadd.f32 1.0, %v305_v24 }
 0x125   : > { %306 = vrcp.f32 %v204_v25  ;;  %v216_v31 = vand.u32 2147483648, %v204_v25  ;;  %v214_v33 = vand.u32 2147483647, %v204_v25  ;;  %vm210_vm3 = vweird.f32 %v204_v25 }
 0x127   : > { %v217_v36 = vor.u32 1.1754944e-38, %v216_v31  ;;  %vm215_vm5 = vcmp.eq.f32.partialorder %v214_v33, 8.507059e+37 }
 0x12b   : > { %v307_v26 = vpop.eup %306 }
 0x12c   : > { %v206_v27 = vmul.f32 %v307_v26, %v204_v25  ;;  %vm211_vm2 = vweird.f32 %v307_v26 }
 0x12d   : > { %vm212_vm4 = vmor %vm210_vm3, %vm211_vm2 }
 0x12e   : > { %v207_v30 = vsub.f32 1.0, %v206_v27 }
 0x130   : > { %v208_v32 = vmul.f32 %v307_v26, %v207_v30 }
 0x132   : > { %v209_v35 = vadd.f32 %v307_v26, %v208_v32 }
 0x134   : > { %v213_v37 = vsel %vm212_vm4, %v307_v26, %v209_v35 }
 0x135   : > { %v218_v38 = vsel %vm215_vm5, %v217_v36, %v213_v37 }
 0x136   : > { %v223_v39 = vperm.slane %v218_v38, %v222_v34 }
 0x138   : > { %v225_v40 = vmul.f32 %v223_v39, %v171_v0 }
 0x13a   : > { %226 = vst [vmem:[%s170_s24] sm:$0xff] %v225_v40 }
 0x13b PF: > { %s13_s12 = sadd.s32 1, %s314_s12  }
 0x13c   : > { %p10_p4 = scmp.ge.s32.totalorder %s13_s12, 4  }
 0x13e   :  { %12 = sbr.rel (!%p10_p4) target bundleno = 1 (0x1), region = 62 }

</bundles_post_ra>
